<compile_context>
chip_gen: v7x
topology: tpu7x:2x2x1
jax: 0.10.0
libtpu: 0.0.40
codegen_flags: <defaults>
</compile_context>

<pallas_src>
import functools

import jax
import jax.numpy as jnp
from jax.experimental import pallas as pl
from jax.experimental.pallas import tpu as pltpu


def _sandwich_kernel(x_ref, rays_ref, w1_ref, w2_ref, out_ref):
    # x_ref   : (9, T)  VMEM   rows: albedo(0:3), spec(3:6), timefeat(6:9)
    # rays_ref: (6, T)  VMEM
    # w1_ref  : (6, 12) SMEM   (out, in) for mlp1
    # w2_ref  : (3, 6)  SMEM   (out, in) for mlp2
    # out_ref : (3, T)  VMEM
    f32 = jnp.float32

    # 12 "specular" input rows in mlp1's input order: spec, timefeat, rays.
    feat = [x_ref[3 + k:4 + k, :].astype(f32) for k in range(6)]
    feat += [rays_ref[k:k + 1, :].astype(f32) for k in range(6)]
    albedo = [x_ref[c:c + 1, :].astype(f32) for c in range(3)]

    # mlp1 (1x1 conv, 12 -> 6) + ReLU, unrolled as scalar-broadcast FMAs.
    h = []
    for c in range(6):
        acc = w1_ref[c, 0] * feat[0]
        for k in range(1, 12):
            acc = acc + w1_ref[c, k] * feat[k]
        h.append(jnp.maximum(acc, 0.0))

    # mlp2 (1x1 conv, 6 -> 3) + residual add + sigmoid.
    rows = []
    for c in range(3):
        s = w2_ref[c, 0] * h[0]
        for j in range(1, 6):
            s = s + w2_ref[c, j] * h[j]
        rows.append(jax.nn.sigmoid(albedo[c] + s))

    out_ref[...] = jnp.concatenate(rows, axis=0).astype(out_ref.dtype)


@functools.partial(jax.jit, static_argnames=("tile_px",))
def sandwich_forward(x, rays, w1, w2, *, tile_px=8192):
    """x: (N, 9, H, W), rays: (N, 6, H, W), w1: (6,12,1,1), w2: (3,6,1,1)."""
    N, C, H, W = x.shape
    assert C == 9 and rays.shape == (N, 6, H, W)
    assert tile_px % 128 == 0

    HW = H * W
    # Free reshapes: NCHW -> (N, C, H*W).  No transposes, no concatenation.
    x3 = x.reshape(N, 9, HW)
    r3 = rays.reshape(N, 6, HW)

    # Pad the pixel axis to a multiple of 128 only if needed (rare for images).
    HW_pad = ((HW + 127) // 128) * 128
    if HW_pad != HW:
        x3 = jnp.pad(x3, ((0, 0), (0, 0), (0, HW_pad - HW)))
        r3 = jnp.pad(r3, ((0, 0), (0, 0), (0, HW_pad - HW)))

    t = min(tile_px, HW_pad)                 # still a multiple of 128
    grid = (N, pl.cdiv(HW_pad, t))

    # Conv weights (out, in, 1, 1) -> (out, in) matrices, f32, in SMEM.
    w1_mat = w1.reshape(6, 12).astype(jnp.float32)
    w2_mat = w2.reshape(3, 6).astype(jnp.float32)

    out = pl.pallas_call(
        _sandwich_kernel,
        out_shape=jax.ShapeDtypeStruct((N, 3, HW_pad), x.dtype),
        grid_spec=pltpu.PrefetchScalarGridSpec(
            num_scalar_prefetch=0,
            grid=grid,
            in_specs=[
                pl.BlockSpec((None, 9, t), lambda n, p: (n, 0, p)),
                pl.BlockSpec((None, 6, t), lambda n, p: (n, 0, p)),
                pl.BlockSpec(memory_space=pltpu.MemorySpace.SMEM),
                pl.BlockSpec(memory_space=pltpu.MemorySpace.SMEM),
            ],
            out_specs=pl.BlockSpec((None, 3, t), lambda n, p: (n, 0, p)),
        ),
        compiler_params=pltpu.CompilerParams(
            dimension_semantics=("parallel", "parallel")),
    )(x3, r3, w1_mat, w2_mat)

    # Drop any pixel padding (no-op slice when HW is already 128-aligned).
    return out[:, :, :HW].reshape(N, 3, H, W)


def _reference(x, rays, w1, w2):
    """Pure-JAX reference of the PyTorch forward (for a sanity check)."""
    albedo, spec, timef = jnp.split(x, 3, axis=1)
    x12 = jnp.concatenate([spec, timef, rays], axis=1)      # (N, 12, H, W)
    h = jnp.einsum("oi,nihw->nohw", w1.reshape(6, 12), x12)
    h = jnp.maximum(h, 0.0)
    s = jnp.einsum("oi,nihw->nohw", w2.reshape(3, 6), h)
    return jax.nn.sigmoid(albedo + s)


if __name__ == "__main__":
    key = jax.random.PRNGKey(0)
    k_x, k_r, k_w1, k_w2 = jax.random.split(key, 4)

    N, H, W = 2, 16, 16
    x = jax.random.normal(k_x, (N, 9, H, W), dtype=jnp.float32)
    rays = jax.random.normal(k_r, (N, 6, H, W), dtype=jnp.float32)

    # Deterministic synthetic conv weights (shapes from nn.Conv2d, bias=False).
    w1 = jax.random.normal(k_w1, (6, 12, 1, 1), dtype=jnp.float32) * 0.2
    w2 = jax.random.normal(k_w2, (3, 6, 1, 1), dtype=jnp.float32) * 0.2

    out = sandwich_forward(x, rays, w1, w2)
    out = jax.block_until_ready(out)

    ref = _reference(x, rays, w1, w2)
    assert out.shape == (N, 3, H, W)
    assert jnp.allclose(out, ref, atol=1e-5, rtol=1e-5)

    print("KERNEL_OK")
</pallas_src>

<mosaic_0001>
module attributes {stable_mosaic.version = 11 : i64} {
  func.func @_sandwich_kernel(%arg0: i32, %arg1: i32, %arg2: memref<1x9x256xf32, #tpu.memory_space<vmem>>, %arg3: memref<1x6x256xf32, #tpu.memory_space<vmem>>, %arg4: memref<6x12xf32, #tpu.memory_space<smem>>, %arg5: memref<3x6xf32, #tpu.memory_space<smem>>, %arg6: memref<1x3x256xf32, #tpu.memory_space<vmem>>) attributes {dimension_semantics = [#tpu.dimension_semantics<parallel>, #tpu.dimension_semantics<parallel>], iteration_bounds = array<i64: 2, 1>, scalar_prefetch = 0 : i64, scratch_operands = 0 : i64, tpu.core_type = #tpu.core_type<tc>, window_params = [{transform_indices = @transform_0, window_bounds = array<i64: 1, 9, 256>}, {transform_indices = @transform_1, window_bounds = array<i64: 1, 6, 256>}, {transform_indices = @transform_2, window_bounds = array<i64: 6, 12>}, {transform_indices = @transform_3, window_bounds = array<i64: 3, 6>}, {transform_indices = @transform_4, window_bounds = array<i64: 1, 3, 256>}]} {
    %c0 = arith.constant 0 : index
    %c3 = arith.constant 3 : index
    %c0_0 = arith.constant 0 : index
    %0 = vector.load %arg2[%c0, %c3, %c0_0] : memref<1x9x256xf32, #tpu.memory_space<vmem>>, vector<1x1x256xf32>
    %1 = vector.shape_cast %0 : vector<1x1x256xf32> to vector<1x256xf32>
    %c0_1 = arith.constant 0 : index
    %c4 = arith.constant 4 : index
    %c0_2 = arith.constant 0 : index
    %2 = vector.load %arg2[%c0_1, %c4, %c0_2] : memref<1x9x256xf32, #tpu.memory_space<vmem>>, vector<1x1x256xf32>
    %3 = vector.shape_cast %2 : vector<1x1x256xf32> to vector<1x256xf32>
    %c0_3 = arith.constant 0 : index
    %c5 = arith.constant 5 : index
    %c0_4 = arith.constant 0 : index
    %4 = vector.load %arg2[%c0_3, %c5, %c0_4] : memref<1x9x256xf32, #tpu.memory_space<vmem>>, vector<1x1x256xf32>
    %5 = vector.shape_cast %4 : vector<1x1x256xf32> to vector<1x256xf32>
    %c0_5 = arith.constant 0 : index
    %c6 = arith.constant 6 : index
    %c0_6 = arith.constant 0 : index
    %6 = vector.load %arg2[%c0_5, %c6, %c0_6] : memref<1x9x256xf32, #tpu.memory_space<vmem>>, vector<1x1x256xf32>
    %7 = vector.shape_cast %6 : vector<1x1x256xf32> to vector<1x256xf32>
    %c0_7 = arith.constant 0 : index
    %c7 = arith.constant 7 : index
    %c0_8 = arith.constant 0 : index
    %8 = vector.load %arg2[%c0_7, %c7, %c0_8] : memref<1x9x256xf32, #tpu.memory_space<vmem>>, vector<1x1x256xf32>
    %9 = vector.shape_cast %8 : vector<1x1x256xf32> to vector<1x256xf32>
    %c0_9 = arith.constant 0 : index
    %c8 = arith.constant 8 : index
    %c0_10 = arith.constant 0 : index
    %10 = vector.load %arg2[%c0_9, %c8, %c0_10] : memref<1x9x256xf32, #tpu.memory_space<vmem>>, vector<1x1x256xf32>
    %11 = vector.shape_cast %10 : vector<1x1x256xf32> to vector<1x256xf32>
    %c0_11 = arith.constant 0 : index
    %c0_12 = arith.constant 0 : index
    %c0_13 = arith.constant 0 : index
    %12 = vector.load %arg3[%c0_11, %c0_12, %c0_13] : memref<1x6x256xf32, #tpu.memory_space<vmem>>, vector<1x1x256xf32>
    %13 = vector.shape_cast %12 : vector<1x1x256xf32> to vector<1x256xf32>
    %c0_14 = arith.constant 0 : index
    %c1 = arith.constant 1 : index
    %c0_15 = arith.constant 0 : index
    %14 = vector.load %arg3[%c0_14, %c1, %c0_15] : memref<1x6x256xf32, #tpu.memory_space<vmem>>, vector<1x1x256xf32>
    %15 = vector.shape_cast %14 : vector<1x1x256xf32> to vector<1x256xf32>
    %c0_16 = arith.constant 0 : index
    %c2 = arith.constant 2 : index
    %c0_17 = arith.constant 0 : index
    %16 = vector.load %arg3[%c0_16, %c2, %c0_17] : memref<1x6x256xf32, #tpu.memory_space<vmem>>, vector<1x1x256xf32>
    %17 = vector.shape_cast %16 : vector<1x1x256xf32> to vector<1x256xf32>
    %c0_18 = arith.constant 0 : index
    %c3_19 = arith.constant 3 : index
    %c0_20 = arith.constant 0 : index
    %18 = vector.load %arg3[%c0_18, %c3_19, %c0_20] : memref<1x6x256xf32, #tpu.memory_space<vmem>>, vector<1x1x256xf32>
    %19 = vector.shape_cast %18 : vector<1x1x256xf32> to vector<1x256xf32>
    %c0_21 = arith.constant 0 : index
    %c4_22 = arith.constant 4 : index
    %c0_23 = arith.constant 0 : index
    %20 = vector.load %arg3[%c0_21, %c4_22, %c0_23] : memref<1x6x256xf32, #tpu.memory_space<vmem>>, vector<1x1x256xf32>
    %21 = vector.shape_cast %20 : vector<1x1x256xf32> to vector<1x256xf32>
    %c0_24 = arith.constant 0 : index
    %c5_25 = arith.constant 5 : index
    %c0_26 = arith.constant 0 : index
    %22 = vector.load %arg3[%c0_24, %c5_25, %c0_26] : memref<1x6x256xf32, #tpu.memory_space<vmem>>, vector<1x1x256xf32>
    %23 = vector.shape_cast %22 : vector<1x1x256xf32> to vector<1x256xf32>
    %c0_27 = arith.constant 0 : index
    %c0_28 = arith.constant 0 : index
    %c0_29 = arith.constant 0 : index
    %24 = vector.load %arg2[%c0_27, %c0_28, %c0_29] : memref<1x9x256xf32, #tpu.memory_space<vmem>>, vector<1x1x256xf32>
    %25 = vector.shape_cast %24 : vector<1x1x256xf32> to vector<1x256xf32>
    %c0_30 = arith.constant 0 : index
    %c1_31 = arith.constant 1 : index
    %c0_32 = arith.constant 0 : index
    %26 = vector.load %arg2[%c0_30, %c1_31, %c0_32] : memref<1x9x256xf32, #tpu.memory_space<vmem>>, vector<1x1x256xf32>
    %27 = vector.shape_cast %26 : vector<1x1x256xf32> to vector<1x256xf32>
    %c0_33 = arith.constant 0 : index
    %c2_34 = arith.constant 2 : index
    %c0_35 = arith.constant 0 : index
    %28 = vector.load %arg2[%c0_33, %c2_34, %c0_35] : memref<1x9x256xf32, #tpu.memory_space<vmem>>, vector<1x1x256xf32>
    %29 = vector.shape_cast %28 : vector<1x1x256xf32> to vector<1x256xf32>
    %c0_36 = arith.constant 0 : index
    %c0_37 = arith.constant 0 : index
    %30 = memref.load %arg4[%c0_36, %c0_37] : memref<6x12xf32, #tpu.memory_space<smem>>
    %31 = vector.broadcast %30 : f32 to vector<1x256xf32>
    %32 = arith.mulf %31, %1 : vector<1x256xf32>
    %c0_38 = arith.constant 0 : index
    %c1_39 = arith.constant 1 : index
    %33 = memref.load %arg4[%c0_38, %c1_39] : memref<6x12xf32, #tpu.memory_space<smem>>
    %34 = vector.broadcast %33 : f32 to vector<1x256xf32>
    %35 = arith.mulf %34, %3 : vector<1x256xf32>
    %36 = arith.addf %32, %35 : vector<1x256xf32>
    %c0_40 = arith.constant 0 : index
    %c2_41 = arith.constant 2 : index
    %37 = memref.load %arg4[%c0_40, %c2_41] : memref<6x12xf32, #tpu.memory_space<smem>>
    %38 = vector.broadcast %37 : f32 to vector<1x256xf32>
    %39 = arith.mulf %38, %5 : vector<1x256xf32>
    %40 = arith.addf %36, %39 : vector<1x256xf32>
    %c0_42 = arith.constant 0 : index
    %c3_43 = arith.constant 3 : index
    %41 = memref.load %arg4[%c0_42, %c3_43] : memref<6x12xf32, #tpu.memory_space<smem>>
    %42 = vector.broadcast %41 : f32 to vector<1x256xf32>
    %43 = arith.mulf %42, %7 : vector<1x256xf32>
    %44 = arith.addf %40, %43 : vector<1x256xf32>
    %c0_44 = arith.constant 0 : index
    %c4_45 = arith.constant 4 : index
    %45 = memref.load %arg4[%c0_44, %c4_45] : memref<6x12xf32, #tpu.memory_space<smem>>
    %46 = vector.broadcast %45 : f32 to vector<1x256xf32>
    %47 = arith.mulf %46, %9 : vector<1x256xf32>
    %48 = arith.addf %44, %47 : vector<1x256xf32>
    %c0_46 = arith.constant 0 : index
    %c5_47 = arith.constant 5 : index
    %49 = memref.load %arg4[%c0_46, %c5_47] : memref<6x12xf32, #tpu.memory_space<smem>>
    %50 = vector.broadcast %49 : f32 to vector<1x256xf32>
    %51 = arith.mulf %50, %11 : vector<1x256xf32>
    %52 = arith.addf %48, %51 : vector<1x256xf32>
    %c0_48 = arith.constant 0 : index
    %c6_49 = arith.constant 6 : index
    %53 = memref.load %arg4[%c0_48, %c6_49] : memref<6x12xf32, #tpu.memory_space<smem>>
    %54 = vector.broadcast %53 : f32 to vector<1x256xf32>
    %55 = arith.mulf %54, %13 : vector<1x256xf32>
    %56 = arith.addf %52, %55 : vector<1x256xf32>
    %c0_50 = arith.constant 0 : index
    %c7_51 = arith.constant 7 : index
    %57 = memref.load %arg4[%c0_50, %c7_51] : memref<6x12xf32, #tpu.memory_space<smem>>
    %58 = vector.broadcast %57 : f32 to vector<1x256xf32>
    %59 = arith.mulf %58, %15 : vector<1x256xf32>
    %60 = arith.addf %56, %59 : vector<1x256xf32>
    %c0_52 = arith.constant 0 : index
    %c8_53 = arith.constant 8 : index
    %61 = memref.load %arg4[%c0_52, %c8_53] : memref<6x12xf32, #tpu.memory_space<smem>>
    %62 = vector.broadcast %61 : f32 to vector<1x256xf32>
    %63 = arith.mulf %62, %17 : vector<1x256xf32>
    %64 = arith.addf %60, %63 : vector<1x256xf32>
    %c0_54 = arith.constant 0 : index
    %c9 = arith.constant 9 : index
    %65 = memref.load %arg4[%c0_54, %c9] : memref<6x12xf32, #tpu.memory_space<smem>>
    %66 = vector.broadcast %65 : f32 to vector<1x256xf32>
    %67 = arith.mulf %66, %19 : vector<1x256xf32>
    %68 = arith.addf %64, %67 : vector<1x256xf32>
    %c0_55 = arith.constant 0 : index
    %c10 = arith.constant 10 : index
    %69 = memref.load %arg4[%c0_55, %c10] : memref<6x12xf32, #tpu.memory_space<smem>>
    %70 = vector.broadcast %69 : f32 to vector<1x256xf32>
    %71 = arith.mulf %70, %21 : vector<1x256xf32>
    %72 = arith.addf %68, %71 : vector<1x256xf32>
    %c0_56 = arith.constant 0 : index
    %c11 = arith.constant 11 : index
    %73 = memref.load %arg4[%c0_56, %c11] : memref<6x12xf32, #tpu.memory_space<smem>>
    %74 = vector.broadcast %73 : f32 to vector<1x256xf32>
    %75 = arith.mulf %74, %23 : vector<1x256xf32>
    %76 = arith.addf %72, %75 : vector<1x256xf32>
    %cst = arith.constant 0.000000e+00 : f32
    %77 = vector.broadcast %cst : f32 to vector<1x256xf32>
    %78 = arith.maximumf %76, %77 : vector<1x256xf32>
    %c1_57 = arith.constant 1 : index
    %c0_58 = arith.constant 0 : index
    %79 = memref.load %arg4[%c1_57, %c0_58] : memref<6x12xf32, #tpu.memory_space<smem>>
    %80 = vector.broadcast %79 : f32 to vector<1x256xf32>
    %81 = arith.mulf %80, %1 : vector<1x256xf32>
    %c1_59 = arith.constant 1 : index
    %c1_60 = arith.constant 1 : index
    %82 = memref.load %arg4[%c1_59, %c1_60] : memref<6x12xf32, #tpu.memory_space<smem>>
    %83 = vector.broadcast %82 : f32 to vector<1x256xf32>
    %84 = arith.mulf %83, %3 : vector<1x256xf32>
    %85 = arith.addf %81, %84 : vector<1x256xf32>
    %c1_61 = arith.constant 1 : index
    %c2_62 = arith.constant 2 : index
    %86 = memref.load %arg4[%c1_61, %c2_62] : memref<6x12xf32, #tpu.memory_space<smem>>
    %87 = vector.broadcast %86 : f32 to vector<1x256xf32>
    %88 = arith.mulf %87, %5 : vector<1x256xf32>
    %89 = arith.addf %85, %88 : vector<1x256xf32>
    %c1_63 = arith.constant 1 : index
    %c3_64 = arith.constant 3 : index
    %90 = memref.load %arg4[%c1_63, %c3_64] : memref<6x12xf32, #tpu.memory_space<smem>>
    %91 = vector.broadcast %90 : f32 to vector<1x256xf32>
    %92 = arith.mulf %91, %7 : vector<1x256xf32>
    %93 = arith.addf %89, %92 : vector<1x256xf32>
    %c1_65 = arith.constant 1 : index
    %c4_66 = arith.constant 4 : index
    %94 = memref.load %arg4[%c1_65, %c4_66] : memref<6x12xf32, #tpu.memory_space<smem>>
    %95 = vector.broadcast %94 : f32 to vector<1x256xf32>
    %96 = arith.mulf %95, %9 : vector<1x256xf32>
    %97 = arith.addf %93, %96 : vector<1x256xf32>
    %c1_67 = arith.constant 1 : index
    %c5_68 = arith.constant 5 : index
    %98 = memref.load %arg4[%c1_67, %c5_68] : memref<6x12xf32, #tpu.memory_space<smem>>
    %99 = vector.broadcast %98 : f32 to vector<1x256xf32>
    %100 = arith.mulf %99, %11 : vector<1x256xf32>
    %101 = arith.addf %97, %100 : vector<1x256xf32>
    %c1_69 = arith.constant 1 : index
    %c6_70 = arith.constant 6 : index
    %102 = memref.load %arg4[%c1_69, %c6_70] : memref<6x12xf32, #tpu.memory_space<smem>>
    %103 = vector.broadcast %102 : f32 to vector<1x256xf32>
    %104 = arith.mulf %103, %13 : vector<1x256xf32>
    %105 = arith.addf %101, %104 : vector<1x256xf32>
    %c1_71 = arith.constant 1 : index
    %c7_72 = arith.constant 7 : index
    %106 = memref.load %arg4[%c1_71, %c7_72] : memref<6x12xf32, #tpu.memory_space<smem>>
    %107 = vector.broadcast %106 : f32 to vector<1x256xf32>
    %108 = arith.mulf %107, %15 : vector<1x256xf32>
    %109 = arith.addf %105, %108 : vector<1x256xf32>
    %c1_73 = arith.constant 1 : index
    %c8_74 = arith.constant 8 : index
    %110 = memref.load %arg4[%c1_73, %c8_74] : memref<6x12xf32, #tpu.memory_space<smem>>
    %111 = vector.broadcast %110 : f32 to vector<1x256xf32>
    %112 = arith.mulf %111, %17 : vector<1x256xf32>
    %113 = arith.addf %109, %112 : vector<1x256xf32>
    %c1_75 = arith.constant 1 : index
    %c9_76 = arith.constant 9 : index
    %114 = memref.load %arg4[%c1_75, %c9_76] : memref<6x12xf32, #tpu.memory_space<smem>>
    %115 = vector.broadcast %114 : f32 to vector<1x256xf32>
    %116 = arith.mulf %115, %19 : vector<1x256xf32>
    %117 = arith.addf %113, %116 : vector<1x256xf32>
    %c1_77 = arith.constant 1 : index
    %c10_78 = arith.constant 10 : index
    %118 = memref.load %arg4[%c1_77, %c10_78] : memref<6x12xf32, #tpu.memory_space<smem>>
    %119 = vector.broadcast %118 : f32 to vector<1x256xf32>
    %120 = arith.mulf %119, %21 : vector<1x256xf32>
    %121 = arith.addf %117, %120 : vector<1x256xf32>
    %c1_79 = arith.constant 1 : index
    %c11_80 = arith.constant 11 : index
    %122 = memref.load %arg4[%c1_79, %c11_80] : memref<6x12xf32, #tpu.memory_space<smem>>
    %123 = vector.broadcast %122 : f32 to vector<1x256xf32>
    %124 = arith.mulf %123, %23 : vector<1x256xf32>
    %125 = arith.addf %121, %124 : vector<1x256xf32>
    %cst_81 = arith.constant 0.000000e+00 : f32
    %126 = vector.broadcast %cst_81 : f32 to vector<1x256xf32>
    %127 = arith.maximumf %125, %126 : vector<1x256xf32>
    %c2_82 = arith.constant 2 : index
    %c0_83 = arith.constant 0 : index
    %128 = memref.load %arg4[%c2_82, %c0_83] : memref<6x12xf32, #tpu.memory_space<smem>>
    %129 = vector.broadcast %128 : f32 to vector<1x256xf32>
    %130 = arith.mulf %129, %1 : vector<1x256xf32>
    %c2_84 = arith.constant 2 : index
    %c1_85 = arith.constant 1 : index
    %131 = memref.load %arg4[%c2_84, %c1_85] : memref<6x12xf32, #tpu.memory_space<smem>>
    %132 = vector.broadcast %131 : f32 to vector<1x256xf32>
    %133 = arith.mulf %132, %3 : vector<1x256xf32>
    %134 = arith.addf %130, %133 : vector<1x256xf32>
    %c2_86 = arith.constant 2 : index
    %c2_87 = arith.constant 2 : index
    %135 = memref.load %arg4[%c2_86, %c2_87] : memref<6x12xf32, #tpu.memory_space<smem>>
    %136 = vector.broadcast %135 : f32 to vector<1x256xf32>
    %137 = arith.mulf %136, %5 : vector<1x256xf32>
    %138 = arith.addf %134, %137 : vector<1x256xf32>
    %c2_88 = arith.constant 2 : index
    %c3_89 = arith.constant 3 : index
    %139 = memref.load %arg4[%c2_88, %c3_89] : memref<6x12xf32, #tpu.memory_space<smem>>
    %140 = vector.broadcast %139 : f32 to vector<1x256xf32>
    %141 = arith.mulf %140, %7 : vector<1x256xf32>
    %142 = arith.addf %138, %141 : vector<1x256xf32>
    %c2_90 = arith.constant 2 : index
    %c4_91 = arith.constant 4 : index
    %143 = memref.load %arg4[%c2_90, %c4_91] : memref<6x12xf32, #tpu.memory_space<smem>>
    %144 = vector.broadcast %143 : f32 to vector<1x256xf32>
    %145 = arith.mulf %144, %9 : vector<1x256xf32>
    %146 = arith.addf %142, %145 : vector<1x256xf32>
    %c2_92 = arith.constant 2 : index
    %c5_93 = arith.constant 5 : index
    %147 = memref.load %arg4[%c2_92, %c5_93] : memref<6x12xf32, #tpu.memory_space<smem>>
    %148 = vector.broadcast %147 : f32 to vector<1x256xf32>
    %149 = arith.mulf %148, %11 : vector<1x256xf32>
    %150 = arith.addf %146, %149 : vector<1x256xf32>
    %c2_94 = arith.constant 2 : index
    %c6_95 = arith.constant 6 : index
    %151 = memref.load %arg4[%c2_94, %c6_95] : memref<6x12xf32, #tpu.memory_space<smem>>
    %152 = vector.broadcast %151 : f32 to vector<1x256xf32>
    %153 = arith.mulf %152, %13 : vector<1x256xf32>
    %154 = arith.addf %150, %153 : vector<1x256xf32>
    %c2_96 = arith.constant 2 : index
    %c7_97 = arith.constant 7 : index
    %155 = memref.load %arg4[%c2_96, %c7_97] : memref<6x12xf32, #tpu.memory_space<smem>>
    %156 = vector.broadcast %155 : f32 to vector<1x256xf32>
    %157 = arith.mulf %156, %15 : vector<1x256xf32>
    %158 = arith.addf %154, %157 : vector<1x256xf32>
    %c2_98 = arith.constant 2 : index
    %c8_99 = arith.constant 8 : index
    %159 = memref.load %arg4[%c2_98, %c8_99] : memref<6x12xf32, #tpu.memory_space<smem>>
    %160 = vector.broadcast %159 : f32 to vector<1x256xf32>
    %161 = arith.mulf %160, %17 : vector<1x256xf32>
    %162 = arith.addf %158, %161 : vector<1x256xf32>
    %c2_100 = arith.constant 2 : index
    %c9_101 = arith.constant 9 : index
    %163 = memref.load %arg4[%c2_100, %c9_101] : memref<6x12xf32, #tpu.memory_space<smem>>
    %164 = vector.broadcast %163 : f32 to vector<1x256xf32>
    %165 = arith.mulf %164, %19 : vector<1x256xf32>
    %166 = arith.addf %162, %165 : vector<1x256xf32>
    %c2_102 = arith.constant 2 : index
    %c10_103 = arith.constant 10 : index
    %167 = memref.load %arg4[%c2_102, %c10_103] : memref<6x12xf32, #tpu.memory_space<smem>>
    %168 = vector.broadcast %167 : f32 to vector<1x256xf32>
    %169 = arith.mulf %168, %21 : vector<1x256xf32>
    %170 = arith.addf %166, %169 : vector<1x256xf32>
    %c2_104 = arith.constant 2 : index
    %c11_105 = arith.constant 11 : index
    %171 = memref.load %arg4[%c2_104, %c11_105] : memref<6x12xf32, #tpu.memory_space<smem>>
    %172 = vector.broadcast %171 : f32 to vector<1x256xf32>
    %173 = arith.mulf %172, %23 : vector<1x256xf32>
    %174 = arith.addf %170, %173 : vector<1x256xf32>
    %cst_106 = arith.constant 0.000000e+00 : f32
    %175 = vector.broadcast %cst_106 : f32 to vector<1x256xf32>
    %176 = arith.maximumf %174, %175 : vector<1x256xf32>
    %c3_107 = arith.constant 3 : index
    %c0_108 = arith.constant 0 : index
    %177 = memref.load %arg4[%c3_107, %c0_108] : memref<6x12xf32, #tpu.memory_space<smem>>
    %178 = vector.broadcast %177 : f32 to vector<1x256xf32>
    %179 = arith.mulf %178, %1 : vector<1x256xf32>
    %c3_109 = arith.constant 3 : index
    %c1_110 = arith.constant 1 : index
    %180 = memref.load %arg4[%c3_109, %c1_110] : memref<6x12xf32, #tpu.memory_space<smem>>
    %181 = vector.broadcast %180 : f32 to vector<1x256xf32>
    %182 = arith.mulf %181, %3 : vector<1x256xf32>
    %183 = arith.addf %179, %182 : vector<1x256xf32>
    %c3_111 = arith.constant 3 : index
    %c2_112 = arith.constant 2 : index
    %184 = memref.load %arg4[%c3_111, %c2_112] : memref<6x12xf32, #tpu.memory_space<smem>>
    %185 = vector.broadcast %184 : f32 to vector<1x256xf32>
    %186 = arith.mulf %185, %5 : vector<1x256xf32>
    %187 = arith.addf %183, %186 : vector<1x256xf32>
    %c3_113 = arith.constant 3 : index
    %c3_114 = arith.constant 3 : index
    %188 = memref.load %arg4[%c3_113, %c3_114] : memref<6x12xf32, #tpu.memory_space<smem>>
    %189 = vector.broadcast %188 : f32 to vector<1x256xf32>
    %190 = arith.mulf %189, %7 : vector<1x256xf32>
    %191 = arith.addf %187, %190 : vector<1x256xf32>
    %c3_115 = arith.constant 3 : index
    %c4_116 = arith.constant 4 : index
    %192 = memref.load %arg4[%c3_115, %c4_116] : memref<6x12xf32, #tpu.memory_space<smem>>
    %193 = vector.broadcast %192 : f32 to vector<1x256xf32>
    %194 = arith.mulf %193, %9 : vector<1x256xf32>
    %195 = arith.addf %191, %194 : vector<1x256xf32>
    %c3_117 = arith.constant 3 : index
    %c5_118 = arith.constant 5 : index
    %196 = memref.load %arg4[%c3_117, %c5_118] : memref<6x12xf32, #tpu.memory_space<smem>>
    %197 = vector.broadcast %196 : f32 to vector<1x256xf32>
    %198 = arith.mulf %197, %11 : vector<1x256xf32>
    %199 = arith.addf %195, %198 : vector<1x256xf32>
    %c3_119 = arith.constant 3 : index
    %c6_120 = arith.constant 6 : index
    %200 = memref.load %arg4[%c3_119, %c6_120] : memref<6x12xf32, #tpu.memory_space<smem>>
    %201 = vector.broadcast %200 : f32 to vector<1x256xf32>
    %202 = arith.mulf %201, %13 : vector<1x256xf32>
    %203 = arith.addf %199, %202 : vector<1x256xf32>
    %c3_121 = arith.constant 3 : index
    %c7_122 = arith.constant 7 : index
    %204 = memref.load %arg4[%c3_121, %c7_122] : memref<6x12xf32, #tpu.memory_space<smem>>
    %205 = vector.broadcast %204 : f32 to vector<1x256xf32>
    %206 = arith.mulf %205, %15 : vector<1x256xf32>
    %207 = arith.addf %203, %206 : vector<1x256xf32>
    %c3_123 = arith.constant 3 : index
    %c8_124 = arith.constant 8 : index
    %208 = memref.load %arg4[%c3_123, %c8_124] : memref<6x12xf32, #tpu.memory_space<smem>>
    %209 = vector.broadcast %208 : f32 to vector<1x256xf32>
    %210 = arith.mulf %209, %17 : vector<1x256xf32>
    %211 = arith.addf %207, %210 : vector<1x256xf32>
    %c3_125 = arith.constant 3 : index
    %c9_126 = arith.constant 9 : index
    %212 = memref.load %arg4[%c3_125, %c9_126] : memref<6x12xf32, #tpu.memory_space<smem>>
    %213 = vector.broadcast %212 : f32 to vector<1x256xf32>
    %214 = arith.mulf %213, %19 : vector<1x256xf32>
    %215 = arith.addf %211, %214 : vector<1x256xf32>
    %c3_127 = arith.constant 3 : index
    %c10_128 = arith.constant 10 : index
    %216 = memref.load %arg4[%c3_127, %c10_128] : memref<6x12xf32, #tpu.memory_space<smem>>
    %217 = vector.broadcast %216 : f32 to vector<1x256xf32>
    %218 = arith.mulf %217, %21 : vector<1x256xf32>
    %219 = arith.addf %215, %218 : vector<1x256xf32>
    %c3_129 = arith.constant 3 : index
    %c11_130 = arith.constant 11 : index
    %220 = memref.load %arg4[%c3_129, %c11_130] : memref<6x12xf32, #tpu.memory_space<smem>>
    %221 = vector.broadcast %220 : f32 to vector<1x256xf32>
    %222 = arith.mulf %221, %23 : vector<1x256xf32>
    %223 = arith.addf %219, %222 : vector<1x256xf32>
    %cst_131 = arith.constant 0.000000e+00 : f32
    %224 = vector.broadcast %cst_131 : f32 to vector<1x256xf32>
    %225 = arith.maximumf %223, %224 : vector<1x256xf32>
    %c4_132 = arith.constant 4 : index
    %c0_133 = arith.constant 0 : index
    %226 = memref.load %arg4[%c4_132, %c0_133] : memref<6x12xf32, #tpu.memory_space<smem>>
    %227 = vector.broadcast %226 : f32 to vector<1x256xf32>
    %228 = arith.mulf %227, %1 : vector<1x256xf32>
    %c4_134 = arith.constant 4 : index
    %c1_135 = arith.constant 1 : index
    %229 = memref.load %arg4[%c4_134, %c1_135] : memref<6x12xf32, #tpu.memory_space<smem>>
    %230 = vector.broadcast %229 : f32 to vector<1x256xf32>
    %231 = arith.mulf %230, %3 : vector<1x256xf32>
    %232 = arith.addf %228, %231 : vector<1x256xf32>
    %c4_136 = arith.constant 4 : index
    %c2_137 = arith.constant 2 : index
    %233 = memref.load %arg4[%c4_136, %c2_137] : memref<6x12xf32, #tpu.memory_space<smem>>
    %234 = vector.broadcast %233 : f32 to vector<1x256xf32>
    %235 = arith.mulf %234, %5 : vector<1x256xf32>
    %236 = arith.addf %232, %235 : vector<1x256xf32>
    %c4_138 = arith.constant 4 : index
    %c3_139 = arith.constant 3 : index
    %237 = memref.load %arg4[%c4_138, %c3_139] : memref<6x12xf32, #tpu.memory_space<smem>>
    %238 = vector.broadcast %237 : f32 to vector<1x256xf32>
    %239 = arith.mulf %238, %7 : vector<1x256xf32>
    %240 = arith.addf %236, %239 : vector<1x256xf32>
    %c4_140 = arith.constant 4 : index
    %c4_141 = arith.constant 4 : index
    %241 = memref.load %arg4[%c4_140, %c4_141] : memref<6x12xf32, #tpu.memory_space<smem>>
    %242 = vector.broadcast %241 : f32 to vector<1x256xf32>
    %243 = arith.mulf %242, %9 : vector<1x256xf32>
    %244 = arith.addf %240, %243 : vector<1x256xf32>
    %c4_142 = arith.constant 4 : index
    %c5_143 = arith.constant 5 : index
    %245 = memref.load %arg4[%c4_142, %c5_143] : memref<6x12xf32, #tpu.memory_space<smem>>
    %246 = vector.broadcast %245 : f32 to vector<1x256xf32>
    %247 = arith.mulf %246, %11 : vector<1x256xf32>
    %248 = arith.addf %244, %247 : vector<1x256xf32>
    %c4_144 = arith.constant 4 : index
    %c6_145 = arith.constant 6 : index
    %249 = memref.load %arg4[%c4_144, %c6_145] : memref<6x12xf32, #tpu.memory_space<smem>>
    %250 = vector.broadcast %249 : f32 to vector<1x256xf32>
    %251 = arith.mulf %250, %13 : vector<1x256xf32>
    %252 = arith.addf %248, %251 : vector<1x256xf32>
    %c4_146 = arith.constant 4 : index
    %c7_147 = arith.constant 7 : index
    %253 = memref.load %arg4[%c4_146, %c7_147] : memref<6x12xf32, #tpu.memory_space<smem>>
    %254 = vector.broadcast %253 : f32 to vector<1x256xf32>
    %255 = arith.mulf %254, %15 : vector<1x256xf32>
    %256 = arith.addf %252, %255 : vector<1x256xf32>
    %c4_148 = arith.constant 4 : index
    %c8_149 = arith.constant 8 : index
    %257 = memref.load %arg4[%c4_148, %c8_149] : memref<6x12xf32, #tpu.memory_space<smem>>
    %258 = vector.broadcast %257 : f32 to vector<1x256xf32>
    %259 = arith.mulf %258, %17 : vector<1x256xf32>
    %260 = arith.addf %256, %259 : vector<1x256xf32>
    %c4_150 = arith.constant 4 : index
    %c9_151 = arith.constant 9 : index
    %261 = memref.load %arg4[%c4_150, %c9_151] : memref<6x12xf32, #tpu.memory_space<smem>>
    %262 = vector.broadcast %261 : f32 to vector<1x256xf32>
    %263 = arith.mulf %262, %19 : vector<1x256xf32>
    %264 = arith.addf %260, %263 : vector<1x256xf32>
    %c4_152 = arith.constant 4 : index
    %c10_153 = arith.constant 10 : index
    %265 = memref.load %arg4[%c4_152, %c10_153] : memref<6x12xf32, #tpu.memory_space<smem>>
    %266 = vector.broadcast %265 : f32 to vector<1x256xf32>
    %267 = arith.mulf %266, %21 : vector<1x256xf32>
    %268 = arith.addf %264, %267 : vector<1x256xf32>
    %c4_154 = arith.constant 4 : index
    %c11_155 = arith.constant 11 : index
    %269 = memref.load %arg4[%c4_154, %c11_155] : memref<6x12xf32, #tpu.memory_space<smem>>
    %270 = vector.broadcast %269 : f32 to vector<1x256xf32>
    %271 = arith.mulf %270, %23 : vector<1x256xf32>
    %272 = arith.addf %268, %271 : vector<1x256xf32>
    %cst_156 = arith.constant 0.000000e+00 : f32
    %273 = vector.broadcast %cst_156 : f32 to vector<1x256xf32>
    %274 = arith.maximumf %272, %273 : vector<1x256xf32>
    %c5_157 = arith.constant 5 : index
    %c0_158 = arith.constant 0 : index
    %275 = memref.load %arg4[%c5_157, %c0_158] : memref<6x12xf32, #tpu.memory_space<smem>>
    %276 = vector.broadcast %275 : f32 to vector<1x256xf32>
    %277 = arith.mulf %276, %1 : vector<1x256xf32>
    %c5_159 = arith.constant 5 : index
    %c1_160 = arith.constant 1 : index
    %278 = memref.load %arg4[%c5_159, %c1_160] : memref<6x12xf32, #tpu.memory_space<smem>>
    %279 = vector.broadcast %278 : f32 to vector<1x256xf32>
    %280 = arith.mulf %279, %3 : vector<1x256xf32>
    %281 = arith.addf %277, %280 : vector<1x256xf32>
    %c5_161 = arith.constant 5 : index
    %c2_162 = arith.constant 2 : index
    %282 = memref.load %arg4[%c5_161, %c2_162] : memref<6x12xf32, #tpu.memory_space<smem>>
    %283 = vector.broadcast %282 : f32 to vector<1x256xf32>
    %284 = arith.mulf %283, %5 : vector<1x256xf32>
    %285 = arith.addf %281, %284 : vector<1x256xf32>
    %c5_163 = arith.constant 5 : index
    %c3_164 = arith.constant 3 : index
    %286 = memref.load %arg4[%c5_163, %c3_164] : memref<6x12xf32, #tpu.memory_space<smem>>
    %287 = vector.broadcast %286 : f32 to vector<1x256xf32>
    %288 = arith.mulf %287, %7 : vector<1x256xf32>
    %289 = arith.addf %285, %288 : vector<1x256xf32>
    %c5_165 = arith.constant 5 : index
    %c4_166 = arith.constant 4 : index
    %290 = memref.load %arg4[%c5_165, %c4_166] : memref<6x12xf32, #tpu.memory_space<smem>>
    %291 = vector.broadcast %290 : f32 to vector<1x256xf32>
    %292 = arith.mulf %291, %9 : vector<1x256xf32>
    %293 = arith.addf %289, %292 : vector<1x256xf32>
    %c5_167 = arith.constant 5 : index
    %c5_168 = arith.constant 5 : index
    %294 = memref.load %arg4[%c5_167, %c5_168] : memref<6x12xf32, #tpu.memory_space<smem>>
    %295 = vector.broadcast %294 : f32 to vector<1x256xf32>
    %296 = arith.mulf %295, %11 : vector<1x256xf32>
    %297 = arith.addf %293, %296 : vector<1x256xf32>
    %c5_169 = arith.constant 5 : index
    %c6_170 = arith.constant 6 : index
    %298 = memref.load %arg4[%c5_169, %c6_170] : memref<6x12xf32, #tpu.memory_space<smem>>
    %299 = vector.broadcast %298 : f32 to vector<1x256xf32>
    %300 = arith.mulf %299, %13 : vector<1x256xf32>
    %301 = arith.addf %297, %300 : vector<1x256xf32>
    %c5_171 = arith.constant 5 : index
    %c7_172 = arith.constant 7 : index
    %302 = memref.load %arg4[%c5_171, %c7_172] : memref<6x12xf32, #tpu.memory_space<smem>>
    %303 = vector.broadcast %302 : f32 to vector<1x256xf32>
    %304 = arith.mulf %303, %15 : vector<1x256xf32>
    %305 = arith.addf %301, %304 : vector<1x256xf32>
    %c5_173 = arith.constant 5 : index
    %c8_174 = arith.constant 8 : index
    %306 = memref.load %arg4[%c5_173, %c8_174] : memref<6x12xf32, #tpu.memory_space<smem>>
    %307 = vector.broadcast %306 : f32 to vector<1x256xf32>
    %308 = arith.mulf %307, %17 : vector<1x256xf32>
    %309 = arith.addf %305, %308 : vector<1x256xf32>
    %c5_175 = arith.constant 5 : index
    %c9_176 = arith.constant 9 : index
    %310 = memref.load %arg4[%c5_175, %c9_176] : memref<6x12xf32, #tpu.memory_space<smem>>
    %311 = vector.broadcast %310 : f32 to vector<1x256xf32>
    %312 = arith.mulf %311, %19 : vector<1x256xf32>
    %313 = arith.addf %309, %312 : vector<1x256xf32>
    %c5_177 = arith.constant 5 : index
    %c10_178 = arith.constant 10 : index
    %314 = memref.load %arg4[%c5_177, %c10_178] : memref<6x12xf32, #tpu.memory_space<smem>>
    %315 = vector.broadcast %314 : f32 to vector<1x256xf32>
    %316 = arith.mulf %315, %21 : vector<1x256xf32>
    %317 = arith.addf %313, %316 : vector<1x256xf32>
    %c5_179 = arith.constant 5 : index
    %c11_180 = arith.constant 11 : index
    %318 = memref.load %arg4[%c5_179, %c11_180] : memref<6x12xf32, #tpu.memory_space<smem>>
    %319 = vector.broadcast %318 : f32 to vector<1x256xf32>
    %320 = arith.mulf %319, %23 : vector<1x256xf32>
    %321 = arith.addf %317, %320 : vector<1x256xf32>
    %cst_181 = arith.constant 0.000000e+00 : f32
    %322 = vector.broadcast %cst_181 : f32 to vector<1x256xf32>
    %323 = arith.maximumf %321, %322 : vector<1x256xf32>
    %c0_182 = arith.constant 0 : index
    %c0_183 = arith.constant 0 : index
    %324 = memref.load %arg5[%c0_182, %c0_183] : memref<3x6xf32, #tpu.memory_space<smem>>
    %325 = vector.broadcast %324 : f32 to vector<1x256xf32>
    %326 = arith.mulf %325, %78 : vector<1x256xf32>
    %c0_184 = arith.constant 0 : index
    %c1_185 = arith.constant 1 : index
    %327 = memref.load %arg5[%c0_184, %c1_185] : memref<3x6xf32, #tpu.memory_space<smem>>
    %328 = vector.broadcast %327 : f32 to vector<1x256xf32>
    %329 = arith.mulf %328, %127 : vector<1x256xf32>
    %330 = arith.addf %326, %329 : vector<1x256xf32>
    %c0_186 = arith.constant 0 : index
    %c2_187 = arith.constant 2 : index
    %331 = memref.load %arg5[%c0_186, %c2_187] : memref<3x6xf32, #tpu.memory_space<smem>>
    %332 = vector.broadcast %331 : f32 to vector<1x256xf32>
    %333 = arith.mulf %332, %176 : vector<1x256xf32>
    %334 = arith.addf %330, %333 : vector<1x256xf32>
    %c0_188 = arith.constant 0 : index
    %c3_189 = arith.constant 3 : index
    %335 = memref.load %arg5[%c0_188, %c3_189] : memref<3x6xf32, #tpu.memory_space<smem>>
    %336 = vector.broadcast %335 : f32 to vector<1x256xf32>
    %337 = arith.mulf %336, %225 : vector<1x256xf32>
    %338 = arith.addf %334, %337 : vector<1x256xf32>
    %c0_190 = arith.constant 0 : index
    %c4_191 = arith.constant 4 : index
    %339 = memref.load %arg5[%c0_190, %c4_191] : memref<3x6xf32, #tpu.memory_space<smem>>
    %340 = vector.broadcast %339 : f32 to vector<1x256xf32>
    %341 = arith.mulf %340, %274 : vector<1x256xf32>
    %342 = arith.addf %338, %341 : vector<1x256xf32>
    %c0_192 = arith.constant 0 : index
    %c5_193 = arith.constant 5 : index
    %343 = memref.load %arg5[%c0_192, %c5_193] : memref<3x6xf32, #tpu.memory_space<smem>>
    %344 = vector.broadcast %343 : f32 to vector<1x256xf32>
    %345 = arith.mulf %344, %323 : vector<1x256xf32>
    %346 = arith.addf %342, %345 : vector<1x256xf32>
    %347 = arith.addf %25, %346 : vector<1x256xf32>
    %348 = arith.negf %347 : vector<1x256xf32>
    %349 = math.exp %348 : vector<1x256xf32>
    %cst_194 = arith.constant 1.000000e+00 : f32
    %350 = vector.broadcast %cst_194 : f32 to vector<1x256xf32>
    %351 = arith.addf %350, %349 : vector<1x256xf32>
    %352 = arith.divf %350, %351 : vector<1x256xf32>
    %c1_195 = arith.constant 1 : index
    %c0_196 = arith.constant 0 : index
    %353 = memref.load %arg5[%c1_195, %c0_196] : memref<3x6xf32, #tpu.memory_space<smem>>
    %354 = vector.broadcast %353 : f32 to vector<1x256xf32>
    %355 = arith.mulf %354, %78 : vector<1x256xf32>
    %c1_197 = arith.constant 1 : index
    %c1_198 = arith.constant 1 : index
    %356 = memref.load %arg5[%c1_197, %c1_198] : memref<3x6xf32, #tpu.memory_space<smem>>
    %357 = vector.broadcast %356 : f32 to vector<1x256xf32>
    %358 = arith.mulf %357, %127 : vector<1x256xf32>
    %359 = arith.addf %355, %358 : vector<1x256xf32>
    %c1_199 = arith.constant 1 : index
    %c2_200 = arith.constant 2 : index
    %360 = memref.load %arg5[%c1_199, %c2_200] : memref<3x6xf32, #tpu.memory_space<smem>>
    %361 = vector.broadcast %360 : f32 to vector<1x256xf32>
    %362 = arith.mulf %361, %176 : vector<1x256xf32>
    %363 = arith.addf %359, %362 : vector<1x256xf32>
    %c1_201 = arith.constant 1 : index
    %c3_202 = arith.constant 3 : index
    %364 = memref.load %arg5[%c1_201, %c3_202] : memref<3x6xf32, #tpu.memory_space<smem>>
    %365 = vector.broadcast %364 : f32 to vector<1x256xf32>
    %366 = arith.mulf %365, %225 : vector<1x256xf32>
    %367 = arith.addf %363, %366 : vector<1x256xf32>
    %c1_203 = arith.constant 1 : index
    %c4_204 = arith.constant 4 : index
    %368 = memref.load %arg5[%c1_203, %c4_204] : memref<3x6xf32, #tpu.memory_space<smem>>
    %369 = vector.broadcast %368 : f32 to vector<1x256xf32>
    %370 = arith.mulf %369, %274 : vector<1x256xf32>
    %371 = arith.addf %367, %370 : vector<1x256xf32>
    %c1_205 = arith.constant 1 : index
    %c5_206 = arith.constant 5 : index
    %372 = memref.load %arg5[%c1_205, %c5_206] : memref<3x6xf32, #tpu.memory_space<smem>>
    %373 = vector.broadcast %372 : f32 to vector<1x256xf32>
    %374 = arith.mulf %373, %323 : vector<1x256xf32>
    %375 = arith.addf %371, %374 : vector<1x256xf32>
    %376 = arith.addf %27, %375 : vector<1x256xf32>
    %377 = arith.negf %376 : vector<1x256xf32>
    %378 = math.exp %377 : vector<1x256xf32>
    %cst_207 = arith.constant 1.000000e+00 : f32
    %379 = vector.broadcast %cst_207 : f32 to vector<1x256xf32>
    %380 = arith.addf %379, %378 : vector<1x256xf32>
    %381 = arith.divf %379, %380 : vector<1x256xf32>
    %c2_208 = arith.constant 2 : index
    %c0_209 = arith.constant 0 : index
    %382 = memref.load %arg5[%c2_208, %c0_209] : memref<3x6xf32, #tpu.memory_space<smem>>
    %383 = vector.broadcast %382 : f32 to vector<1x256xf32>
    %384 = arith.mulf %383, %78 : vector<1x256xf32>
    %c2_210 = arith.constant 2 : index
    %c1_211 = arith.constant 1 : index
    %385 = memref.load %arg5[%c2_210, %c1_211] : memref<3x6xf32, #tpu.memory_space<smem>>
    %386 = vector.broadcast %385 : f32 to vector<1x256xf32>
    %387 = arith.mulf %386, %127 : vector<1x256xf32>
    %388 = arith.addf %384, %387 : vector<1x256xf32>
    %c2_212 = arith.constant 2 : index
    %c2_213 = arith.constant 2 : index
    %389 = memref.load %arg5[%c2_212, %c2_213] : memref<3x6xf32, #tpu.memory_space<smem>>
    %390 = vector.broadcast %389 : f32 to vector<1x256xf32>
    %391 = arith.mulf %390, %176 : vector<1x256xf32>
    %392 = arith.addf %388, %391 : vector<1x256xf32>
    %c2_214 = arith.constant 2 : index
    %c3_215 = arith.constant 3 : index
    %393 = memref.load %arg5[%c2_214, %c3_215] : memref<3x6xf32, #tpu.memory_space<smem>>
    %394 = vector.broadcast %393 : f32 to vector<1x256xf32>
    %395 = arith.mulf %394, %225 : vector<1x256xf32>
    %396 = arith.addf %392, %395 : vector<1x256xf32>
    %c2_216 = arith.constant 2 : index
    %c4_217 = arith.constant 4 : index
    %397 = memref.load %arg5[%c2_216, %c4_217] : memref<3x6xf32, #tpu.memory_space<smem>>
    %398 = vector.broadcast %397 : f32 to vector<1x256xf32>
    %399 = arith.mulf %398, %274 : vector<1x256xf32>
    %400 = arith.addf %396, %399 : vector<1x256xf32>
    %c2_218 = arith.constant 2 : index
    %c5_219 = arith.constant 5 : index
    %401 = memref.load %arg5[%c2_218, %c5_219] : memref<3x6xf32, #tpu.memory_space<smem>>
    %402 = vector.broadcast %401 : f32 to vector<1x256xf32>
    %403 = arith.mulf %402, %323 : vector<1x256xf32>
    %404 = arith.addf %400, %403 : vector<1x256xf32>
    %405 = arith.addf %29, %404 : vector<1x256xf32>
    %406 = arith.negf %405 : vector<1x256xf32>
    %407 = math.exp %406 : vector<1x256xf32>
    %cst_220 = arith.constant 1.000000e+00 : f32
    %408 = vector.broadcast %cst_220 : f32 to vector<1x256xf32>
    %409 = arith.addf %408, %407 : vector<1x256xf32>
    %410 = arith.divf %408, %409 : vector<1x256xf32>
    %411 = tpu.concatenate %352, %381, %410 in 0 : vector<1x256xf32>, vector<1x256xf32>, vector<1x256xf32> -> vector<3x256xf32>
    %c0_221 = arith.constant 0 : index
    %c0_222 = arith.constant 0 : index
    %c0_223 = arith.constant 0 : index
    %412 = vector.load %arg6[%c0_221, %c0_222, %c0_223] : memref<1x3x256xf32, #tpu.memory_space<vmem>>, vector<1x3x256xf32>
    %413 = vector.shape_cast %412 : vector<1x3x256xf32> to vector<3x256xf32>
    %414 = vector.shape_cast %411 : vector<3x256xf32> to vector<1x3x256xf32>
    tpu.vector_store %arg6[%c0_221, %c0_222, %c0_223], %414 {strides = array<i32>} : memref<1x3x256xf32, #tpu.memory_space<vmem>>, vector<1x3x256xf32>,
    return
  }
  func.func @transform_0(%arg0: i32, %arg1: i32) -> (i32, i32, i32) {
    %c0_i32 = arith.constant 0 : i32
    %c0_i32_0 = arith.constant 0 : i32
    return %arg0, %c0_i32, %arg1 : i32, i32, i32
  }
  func.func @transform_1(%arg0: i32, %arg1: i32) -> (i32, i32, i32) {
    %c0_i32 = arith.constant 0 : i32
    %c0_i32_0 = arith.constant 0 : i32
    return %arg0, %c0_i32, %arg1 : i32, i32, i32
  }
  func.func @transform_2(%arg0: i32, %arg1: i32) -> (i32, i32) {
    %c0_i32 = arith.constant 0 : i32
    %c0_i32_0 = arith.constant 0 : i32
    %c0_i32_1 = arith.constant 0 : i32
    return %c0_i32, %c0_i32_0 : i32, i32
  }
  func.func @transform_3(%arg0: i32, %arg1: i32) -> (i32, i32) {
    %c0_i32 = arith.constant 0 : i32
    %c0_i32_0 = arith.constant 0 : i32
    %c0_i32_1 = arith.constant 0 : i32
    return %c0_i32, %c0_i32_0 : i32, i32
  }
  func.func @transform_4(%arg0: i32, %arg1: i32) -> (i32, i32, i32) {
    %c0_i32 = arith.constant 0 : i32
    %c0_i32_0 = arith.constant 0 : i32
    return %arg0, %c0_i32, %arg1 : i32, i32, i32
  }
}

</mosaic_0001>

<bundles_post_ra>
// kernel: sandwich_forward.1
= control target key start
LH: loop header
LB: loop body
LE: loop exit
PB: predicated region body
PF: predicated region fallthrough
CT: control target
= control target key end

     0   :  { %9 = vsyncpa [#allocation3], 0  ;;  %s1603_s0 = inlined_call_operand.vmem [shape: f32[2,9,256], index: 0, kind: input, shape index: {}]   ;;  %s1604_s1 = inlined_call_operand.vmem [shape: f32[2,6,256], index: 1, kind: input, shape index: {}]   ;;  %s1605_s2 = inlined_call_operand.vmem [shape: f32[6,12], index: 2, kind: input, shape index: {}]   ;;  %s1606_s3 = inlined_call_operand.vmem [shape: f32[3,6], index: 3, kind: input, shape index: {}]   ;;  %s1607_s4 = inlined_call_operand.vmem [shape: f32[2,3,256], index: 4, kind: output, shape index: {}]  }
   0x1   :  { %10 = vsyncpa [#allocation5], 0  ;;  %s1147_s15 = smov 0   ;;  %s1149_s16 = smov 0  }
   0x2   :  { %s1151_s17 = smov 0  }
   0x3 LB: > { %s877_s18 = sadd.s32 4294967295, %s1118_s17   ;;  %s28_s19 = sadd.s32 1, %s1114_s16  ;;  %s1118_s17 = sphi %s1151_s17, %s16_s17   ;;  %s1114_s16 = sphi %s1149_s16, %s1617_s16   ;;  %s1110_s15 = sphi %s1147_s15, %s1616_s15  }
   0x4   : > { %p30_p0 = scmp.ge.s32.totalorder %s28_s19, 2  ;;  %p879_p1 = scmp.ge.s32.totalorder %s1118_s17, 1 }
   0x5   : > { %p159_p2 = scmp.lt.s32.totalorder %s1118_s17, 3  ;;  %p1172_p4 = scmp.eq.s32.totalorder %s877_s18, 0 }
   0x6   : > { %s1619_s19 = smov (%p30_p0, %s28_s19), 0  ;;  %s172_s24 = sshll.u32 %s1605_s2, 4  ;;  %s173_s24 = int_to_ptr.vmem [resolvable:$true] %s172_s24 }
   0x7   : > { %p1168_p3 = pnand %p879_p1, %p159_p2  ;;  %s183_s27 = sshll.u32 %s1606_s3, 4  ;;  %s184_s27 = int_to_ptr.vmem [resolvable:$true] %s183_s27 }
   0x8   : > { %s1612_s21 = scalar_select %p1172_p4, 1, 0 }
   0x9   : > { %s1611_s20 = scalar_select %p1168_p3, 1, 0 }
   0xa   : > { %p1009_p5 = pneg %p1168_p3  ;;  %s1058_s29 = scalar_lea.vmem %s173_s24, 128 }
   0xb   : > { %p1059_p7 = scmp.ne.s32.totalorder %s173_s24, %s1058_s29  ;;  %p1066_p11 = scmp.lt.s32.totalorder %s173_s24, %s173_s24 }
   0xc   : > { %p1186_p6 = pnand %p1172_p4, %p1009_p5  ;;  %p1067_p12 = scmp.lt.s32.totalorder %s1058_s29, %s1058_s29 }
   0xe   : > { %p1060_p8 = pneg %p1186_p6  ;;  %p1068_p13 = por %p1067_p12, %p1066_p11 }
  0x10   : > { %p1061_p9 = pnand %p1060_p8, %p1059_p7 }
  0x12   : > { %p1062_p10 = pneg %p1061_p9 }
  0x14   : > { %p1069_p0 = pnand %p1068_p13, %p1062_p10 }
  0x16   : > { %1072 = shalt.err (!%p1069_p0)
}
  0x17   : > { %s1120_s30 = smov [#allocation2]   ;;  %s1073_s5 = scalar_lea.vmem %s184_s27, 64 }
  0x18   : > { %1012 = dma.vmem_to_smem (!%p1186_p6), %s173_s24, 128, %s1120_s30, [#allocation3]  }
  0x19   : > { %p1074_p1 = scmp.ne.s32.totalorder %s184_s27, %s1073_s5  ;;  %p1081_p4 = scmp.lt.s32.totalorder %s184_s27, %s184_s27 }
  0x1a   : > { %p1082_p3 = scmp.lt.s32.totalorder %s1073_s5, %s1073_s5 }
  0x1b   : > { %p1076_p2 = pnand %p1074_p1, %p1060_p8 }
  0x1c   : > { %p1083_p7 = por %p1082_p3, %p1081_p4 }
  0x1d   : > { %p1077_p5 = pneg %p1076_p2 }
  0x1f   : > { %p1084_p9 = pnand %p1083_p7, %p1077_p5 }
  0x21   : > { %1087 = shalt.err (!%p1084_p9)
}
  0x22   : > { %s1121_s6 = smov [#allocation4]   ;;  %p1614_p10 = scmp.ne.s32.totalorder %s1611_s20, 0 }
  0x23   : > { %1015 = dma.vmem_to_smem (!%p1186_p6), %s184_s27, 64, %s1121_s6, [#allocation5]  }
  0x24   : > { %222 = sbr.rel (%p1614_p10) target bundleno = 167 (0xa7), region = 36  ;;  %p1615_p11 = scmp.ne.s32.totalorder (!%p1614_p10), %s1612_s21, 0 }
  0x2b   : > { %1101 = dma.done.wait (%p1615_p11), [#allocation3], 128  }
  0x2c   : > { %1103 = vsyncadd (%p1615_p11), [#allocation3], 4294967168 }
  0x2d   : > { %1105 = dma.done.wait (%p1615_p11), [#allocation5], 64  }
  0x2e   : > { %1107 = vsyncadd (%p1615_p11), [#allocation5], 4294967232 }
  0x2f   : > { %232 = sfence }
  0x30   : > { %p271_p3 = scmp.lt.s32.totalorder %s1110_s15, 1  ;;  %s328_s7 = sld [smem:[#allocation2]]  ;;  %vm739_vm0 = vcmask 1040384   ;;  %vm742_vm1 = vcmask 1041408  }
  0x31   : > { %s905_s8 = sld [smem:[#allocation2 + $0x1]]  ;;  %s906_s9 = sld [smem:[#allocation2 + $0x2]] }
  0x32   : > { %s1621_s15 = smov (!%p271_p3, %s1110_s15), 1  ;;  %s907_s10 = sld [smem:[#allocation2 + $0x3]] }
  0x33   : > { %s908_s11 = sld [smem:[#allocation2 + $0x4]]  ;;  %s998_s12 = sshll.u32 %s1621_s15, 5 }
  0x34   : > { %s1214_s18 = scalar_lea.vmem %s1603_s0, %s998_s12  ;;  %s909_s20 = sld [smem:[#allocation2 + $0x5]] }
  0x35   : > { %v1217_v0 = vld [vmem:[%s1214_s18 + $0x3] ss:$8 sm:$0x3]  ;;  %v1220_v2 = vld [vmem:[%s1214_s18 + $0x4] ss:$8 sm:$0x3] }
  0x36   : > { %v329_v1 = vstv %s328_s7  ;;  %v1223_v3 = vld [vmem:[%s1214_s18 + $0x5] ss:$8 sm:$0x3]  ;;  %v1227_v7 = vld [vmem:[%s1214_s18 + $0x6] ss:$8 sm:$0x3] }
  0x37   : > { %v330_v4 = vmul.f32 %v1217_v0, %v329_v1  ;;  %v332_v5 = vstv %s905_s8  ;;  %v336_v6 = vstv %s906_s9  ;;  %v1232_v10 = vld [vmem:[%s1214_s18 + $0x7] ss:$8 sm:$0x3]  ;;  %s999_s21 = sshll.u32 %s1621_s15, 4  ;;  %s910_s25 = sld [smem:[#allocation2 + $0x6]] }
  0x38   : > { %v333_v8 = vmul.f32 %v1220_v2, %v332_v5  ;;  %v337_v9 = vmul.f32 %v1223_v3, %v336_v6  ;;  %v340_v11 = vstv %s907_s10  ;;  %v1237_v15 = vld [vmem:[%s1214_s18 + $0x10] ss:$8 sm:$0x3]  ;;  %s1243_s24 = scalar_lea.vmem %s1604_s1, %s999_s21  ;;  %s911_s26 = sld [smem:[#allocation2 + $0x7]] }
  0x39   : > { %v344_v12 = vstv %s908_s11  ;;  %v341_v14 = vmul.f32 %v1227_v7, %v340_v11  ;;  %s912_s27 = sld [smem:[#allocation2 + $0x8]]  ;;  %s913_s28 = sld [smem:[#allocation2 + $0x9]]  ;;  %v1247_v21 = vld [vmem:[%s1243_s24] ss:$8 sm:$0x3] }
  0x3a   : > { %v334_v13 = vadd.f32 %v333_v8, %v330_v4  ;;  %v345_v17 = vmul.f32 %v1232_v10, %v344_v12  ;;  %v348_v18 = vstv %s909_s20  ;;  %v1250_v22 = vld [vmem:[%s1243_s24 + $0x1] ss:$8 sm:$0x3]  ;;  %s1252_s29 = sld [smem:[#allocation2 + $0xa]]  ;;  %s1254_s30 = sld [smem:[#allocation2 + $0xb]] }
  0x3b   : > { %v349_v20 = vmul.f32 %v1237_v15, %v348_v18  ;;  %v1257_v24 = vld [vmem:[%s1243_s24 + $0x2] ss:$8 sm:$0x3]  ;;  %s916_s5 = sld [smem:[#allocation2 + $0x80]]  ;;  %s1259_s6 = sld [smem:[#allocation2 + $0x81]] }
  0x3c   : > { %v338_v16 = vadd.f32 %v337_v9, %v334_v13  ;;  %v1262_v25 = vld [vmem:[%s1243_s24 + $0x3] ss:$8 sm:$0x3]  ;;  %s1264_s7 = sld [smem:[#allocation2 + $0x82]]  ;;  %s1266_s8 = sld [smem:[#allocation2 + $0x83]] }
  0x3d   : > { %s1268_s9 = sld [smem:[#allocation2 + $0x84]]  ;;  %s1270_s10 = sld [smem:[#allocation2 + $0x85]]  ;;  %v352_v27 = vstv %s910_s25  ;;  %v1277_v29 = vld [vmem:[%s1243_s24 + $0x4] ss:$8 sm:$0x3] }
  0x3e   : > { %v342_v19 = vadd.f32 %v341_v14, %v338_v16  ;;  %v356_v28 = vstv %s911_s26  ;;  %s1272_s11 = sld [smem:[#allocation2 + $0x86]]  ;;  %s1274_s12 = sld [smem:[#allocation2 + $0x87]]  ;;  %v353_v30 = vmul.f32 %v352_v27, %v1247_v21  ;;  %v1303_v43 = vld [vmem:[%s1243_s24 + $0x5] ss:$8 sm:$0x3] }
  0x3f   : > { %v357_v31 = vmul.f32 %v1250_v22, %v356_v28  ;;  %v360_v32 = vstv %s912_s27  ;;  %v364_v33 = vstv %s913_s28  ;;  %s1281_s13 = sld [smem:[#allocation2 + $0x88]]  ;;  %s1284_s14 = sld [smem:[#allocation2 + $0x89]] }
  0x40   : > { %v346_v23 = vadd.f32 %v345_v17, %v342_v19  ;;  %v361_v34 = vmul.f32 %v1257_v24, %v360_v32  ;;  %s1286_s20 = sld [smem:[#allocation2 + $0x8a]]  ;;  %v365_v36 = vmul.f32 %v1262_v25, %v364_v33  ;;  %v368_v37 = vstv %s1252_s29  ;;  %s1290_s21 = sld [smem:[#allocation2 + $0x100]] }
  0x41   : > { %v377_v38 = vstv %s916_s5  ;;  %s1292_s22 = sld [smem:[#allocation2 + $0x101]]  ;;  %v380_v40 = vstv %s1259_s6  ;;  %s1298_s23 = sld [smem:[#allocation2 + $0x102]]  ;;  %v372_v45 = vstv %s1254_s30  ;;  %v369_v48 = vmul.f32 %v1277_v29, %v368_v37 }
  0x42   : > { %v350_v26 = vadd.f32 %v349_v20, %v346_v23  ;;  %v378_v39 = vmul.f32 %v1217_v0, %v377_v38  ;;  %v384_v41 = vstv %s1264_s7  ;;  %v388_v42 = vstv %s1266_s8  ;;  %s1300_s25 = sld [smem:[#allocation2 + $0x103]]  ;;  %s1314_s27 = sld [smem:[#allocation2 + $0x104]] }
  0x43   : > { %v381_v46 = vmul.f32 %v1220_v2, %v380_v40  ;;  %v385_v47 = vmul.f32 %v1223_v3, %v384_v41  ;;  %v392_v49 = vstv %s1268_s9  ;;  %v396_v50 = vstv %s1270_s10  ;;  %s1312_s26 = sld [smem:[#allocation2 + $0x8b]]  ;;  %s1318_s24 = sld [smem:[#allocation2 + $0x105]] }
  0x44   : > { %v354_v35 = vadd.f32 %v353_v30, %v350_v26  ;;  %v400_v51 = vstv %s1272_s11  ;;  %v389_v54 = vmul.f32 %v1227_v7, %v388_v42  ;;  %v404_v55 = vstv %s1274_s12  ;;  %s1320_s28 = sld [smem:[#allocation2 + $0x106]]  ;;  %s1325_s29 = sld [smem:[#allocation2 + $0x107]] }
  0x45   : > { %v382_v53 = vadd.f32 %v381_v46, %v378_v39  ;;  %v373_v56 = vmul.f32 %v1303_v43, %v372_v45  ;;  %v393_v57 = vmul.f32 %v1232_v10, %v392_v49  ;;  %v408_v58 = vstv %s1281_s13  ;;  %s1327_s30 = sld [smem:[#allocation2 + $0x108]]  ;;  %s1331_s5 = sld [smem:[#allocation2 + $0x109]] }
  0x46   : > { %v358_v44 = vadd.f32 %v357_v31, %v354_v35  ;;  %v397_v61 = vmul.f32 %v1237_v15, %v396_v50  ;;  %v401_v62 = vmul.f32 %v400_v51, %v1247_v21  ;;  %v405_v63 = vmul.f32 %v1250_v22, %v404_v55  ;;  %s1339_s6 = sld [smem:[#allocation2 + $0x180]]  ;;  %s1345_s7 = sld [smem:[#allocation2 + $0x181]] }
  0x47   : > { %v386_v60 = vadd.f32 %v385_v47, %v382_v53  ;;  %v412_v1 = vstv %s1284_s14  ;;  %v425_v4 = vstv %s1290_s21  ;;  %v428_v5 = vstv %s1292_s22  ;;  %s1347_s8 = sld [smem:[#allocation2 + $0x182]]  ;;  %s1353_s10 = sld [smem:[#allocation2 + $0x183]] }
  0x48   : > { %v362_v52 = vadd.f32 %v361_v34, %v358_v44  ;;  %v409_v9 = vmul.f32 %v1257_v24, %v408_v58  ;;  %v416_v11 = vstv %s1286_s20  ;;  %v426_v12 = vmul.f32 %v1217_v0, %v425_v4  ;;  %s1351_s9 = sld [smem:[#allocation2 + $0x10a]]  ;;  %s1358_s11 = sld [smem:[#allocation2 + $0x10b]] }
  0x49   : > { %v390_v8 = vadd.f32 %v389_v54, %v386_v60  ;;  %v429_v13 = vmul.f32 %v1220_v2, %v428_v5  ;;  %v432_v14 = vstv %s1298_s23  ;;  %v436_v16 = vstv %s1300_s25  ;;  %s1360_s12 = sld [smem:[#allocation2 + $0x184]]  ;;  %s1365_s13 = sld [smem:[#allocation2 + $0x185]] }
  0x4a   : > { %v366_v59 = vadd.f32 %v365_v36, %v362_v52  ;;  %v413_v19 = vmul.f32 %v1262_v25, %v412_v1  ;;  %v433_v20 = vmul.f32 %v1223_v3, %v432_v14  ;;  %v420_v23 = vstv %s1312_s26  ;;  %s1367_s14 = sld [smem:[#allocation2 + $0x186]]  ;;  %s1372_s20 = sld [smem:[#allocation2 + $0x187]] }
  0x4b   : > { %v394_v18 = vadd.f32 %v393_v57, %v390_v8  ;;  %v430_v26 = vadd.f32 %v429_v13, %v426_v12  ;;  %v437_v27 = vmul.f32 %v1227_v7, %v436_v16  ;;  %v440_v28 = vstv %s1314_s27  ;;  %s1374_s21 = sld [smem:[#allocation2 + $0x188]]  ;;  %s1383_s22 = sld [smem:[#allocation2 + $0x189]] }
  0x4c   : > { %v370_v6 = vadd.f32 %v369_v48, %v366_v59  ;;  %v417_v31 = vmul.f32 %v1277_v29, %v416_v11  ;;  %v444_v32 = vstv %s1318_s24  ;;  %v448_v33 = vstv %s1320_s28  ;;  %s1388_s23 = sld [smem:[#allocation2 + $0x18a]]  ;;  %s1393_s25 = sld [smem:[#allocation2 + $0x200]] }
  0x4d   : > { %v398_v30 = vadd.f32 %v397_v61, %v394_v18  ;;  %v434_v34 = vadd.f32 %v433_v20, %v430_v26  ;;  %v441_v35 = vmul.f32 %v1232_v10, %v440_v28  ;;  %v452_v36 = vstv %s1325_s29  ;;  %s1395_s26 = sld [smem:[#allocation2 + $0x201]]  ;;  %s1403_s27 = sld [smem:[#allocation2 + $0x202]] }
  0x4e   : > { %v374_v17 = vadd.f32 %v373_v56, %v370_v6  ;;  %v456_v37 = vstv %s1327_s30  ;;  %v421_v40 = vmul.f32 %v1303_v43, %v420_v23  ;;  %v460_v41 = vstv %s1331_s5  ;;  %s1405_s24 = sld [smem:[#allocation2 + $0x203]]  ;;  %s1411_s29 = sld [smem:[#allocation2 + $0x204]] }
  0x4f   : > { %v402_v39 = vadd.f32 %v401_v62, %v398_v30  ;;  %v438_v42 = vadd.f32 %v437_v27, %v434_v34  ;;  %v445_v44 = vmul.f32 %v1237_v15, %v444_v32  ;;  %v449_v45 = vmul.f32 %v448_v33, %v1247_v21  ;;  %s1409_s28 = sld [smem:[#allocation2 + $0x18b]]  ;;  %s1416_s30 = sld [smem:[#allocation2 + $0x205]] }
  0x50   : > { %v1376_v38 = vmax.f32 %v374_v17, 0.0  ;;  %v453_v46 = vmul.f32 %v1250_v22, %v452_v36  ;;  %v457_v48 = vmul.f32 %v1257_v24, %v456_v37  ;;  %v461_v49 = vmul.f32 %v1262_v25, %v460_v41  ;;  %s1420_s5 = sld [smem:[#allocation2 + $0x206]] }
  0x51   : > { %v406_v47 = vadd.f32 %v405_v63, %v402_v39  ;;  %v473_v50 = vstv %s1339_s6  ;;  %v442_v51 = vadd.f32 %v441_v35, %v438_v42  ;;  %v476_v53 = vstv %s1345_s7  ;;  %s1422_s6 = sld [smem:[#allocation2 + $0x207]]  ;;  %s1430_s7 = sld [smem:[#allocation2 + $0x208]] }
  0x52   : > { %v474_v52 = vmul.f32 %v1217_v0, %v473_v50  ;;  %v480_v54 = vstv %s1347_s8  ;;  %v477_v56 = vmul.f32 %v1220_v2, %v476_v53  ;;  %v484_v58 = vstv %s1353_s10  ;;  %s1435_s8 = sld [smem:[#allocation2 + $0x209]]  ;;  %s1441_s10 = sld [smem:[#allocation2 + $0x280]] }
  0x53   : > { %v410_v55 = vadd.f32 %v409_v9, %v406_v47  ;;  %v481_v57 = vmul.f32 %v1223_v3, %v480_v54  ;;  %v446_v59 = vadd.f32 %v445_v44, %v442_v51  ;;  %v464_v60 = vstv %s1351_s9  ;;  %s1439_s9 = sld [smem:[#allocation2 + $0x20a]] }
  0x54   : > { %v468_v61 = vstv %s1358_s11  ;;  %v488_v62 = vstv %s1360_s12  ;;  %v478_v1 = vadd.f32 %v477_v56, %v474_v52  ;;  %v485_v4 = vmul.f32 %v1227_v7, %v484_v58  ;;  %s1446_s11 = sld [smem:[#allocation2 + $0x281]]  ;;  %s1451_s12 = sld [smem:[#allocation2 + $0x282]] }
  0x55   : > { %v414_v63 = vadd.f32 %v413_v19, %v410_v55  ;;  %v492_v5 = vstv %s1365_s13  ;;  %v450_v6 = vadd.f32 %v449_v45, %v446_v59  ;;  %v496_v8 = vstv %s1367_s14  ;;  %s1453_s13 = sld [smem:[#allocation2 + $0x283]] }
  0x56   : > { %v500_v9 = vstv %s1372_s20  ;;  %v504_v11 = vstv %s1374_s21  ;;  %v465_v13 = vmul.f32 %v1277_v29, %v464_v60  ;;  %v482_v14 = vadd.f32 %v481_v57, %v478_v1  ;;  %s1457_s14 = sld [smem:[#allocation2 + $0x20b]]  ;;  %s1459_s20 = sld [smem:[#allocation2 + $0x284]] }
  0x57   : > { %v418_v12 = vadd.f32 %v417_v31, %v414_v63  ;;  %v489_v16 = vmul.f32 %v1232_v10, %v488_v62  ;;  %v454_v17 = vadd.f32 %v453_v46, %v450_v6  ;;  %v469_v18 = vmul.f32 %v1303_v43, %v468_v61  ;;  %s1464_s21 = sld [smem:[#allocation2 + $0x285]] }
  0x58   : > { %v493_v19 = vmul.f32 %v1237_v15, %v492_v5  ;;  %v508_v20 = vstv %s1383_s22  ;;  %v486_v23 = vadd.f32 %v485_v4, %v482_v14  ;;  %v497_v26 = vmul.f32 %v496_v8, %v1247_v21  ;;  %s1469_s22 = sld [smem:[#allocation2 + $0x286]] }
  0x59   : > { %v501_v27 = vmul.f32 %v1250_v22, %v500_v9  ;;  %v505_v28 = vmul.f32 %v1257_v24, %v504_v11  ;;  %v458_v30 = vadd.f32 %v457_v48, %v454_v17  ;;  %v512_v31 = vstv %s1388_s23  ;;  %s1471_s23 = sld [smem:[#allocation2 + $0x287]] }
  0x5a   : > { %v521_v32 = vstv %s1393_s25  ;;  %v524_v33 = vstv %s1395_s26  ;;  %v422_v34 = vadd.f32 %v421_v40, %v418_v12  ;;  %v490_v35 = vadd.f32 %v489_v16, %v486_v23  ;;  %s1479_s25 = sld [smem:[#allocation2 + $0x288]]  ;;  %s1485_s26 = sld [smem:[#allocation2 + $0x289]] }
  0x5b   : > { %v509_v36 = vmul.f32 %v1262_v25, %v508_v20  ;;  %v522_v37 = vmul.f32 %v1217_v0, %v521_v32  ;;  %v462_v39 = vadd.f32 %v461_v49, %v458_v30  ;;  %v525_v41 = vmul.f32 %v1220_v2, %v524_v33 }
  0x5c   : > { %v528_v42 = vstv %s1403_s27  ;;  %v532_v44 = vstv %s1405_s24  ;;  %v494_v40 = vadd.f32 %v493_v19, %v490_v35  ;;  %v516_v45 = vstv %s1409_s28  ;;  %s1490_s27 = sld [smem:[#allocation2 + $0x28a]]  ;;  %s1492_s24 = sld [smem:[#allocation4]] }
  0x5d   : > { %v529_v46 = vmul.f32 %v1223_v3, %v528_v42  ;;  %v536_v47 = vstv %s1411_s29  ;;  %v466_v48 = vadd.f32 %v465_v13, %v462_v39  ;;  %v526_v50 = vadd.f32 %v525_v41, %v522_v37  ;;  %s1497_s28 = sld [smem:[#allocation4 + $0x1]]  ;;  %s1502_s29 = sld [smem:[#allocation4 + $0x2]] }
  0x5e   : > { %v533_v49 = vmul.f32 %v1227_v7, %v532_v44  ;;  %v540_v51 = vstv %s1416_s30  ;;  %v498_v52 = vadd.f32 %v497_v26, %v494_v40  ;;  %v513_v53 = vmul.f32 %v1277_v29, %v512_v31  ;;  %s1506_s30 = sld [smem:[#allocation4 + $0x3]] }
  0x5f   : > { %v544_v54 = vstv %s1420_s5  ;;  %v548_v55 = vstv %s1422_s6  ;;  %v1466_v56 = vmax.f32 %v422_v34, 0.0  ;;  %v470_v57 = vadd.f32 %v469_v18, %v466_v48  ;;  %s1511_s5 = sld [smem:[#allocation2 + $0x28b]]  ;;  %s1513_s6 = sld [smem:[#allocation4 + $0x80]] }
  0x60   : > { %v530_v58 = vadd.f32 %v529_v46, %v526_v50  ;;  %v537_v59 = vmul.f32 %v1232_v10, %v536_v47  ;;  %v502_v60 = vadd.f32 %v501_v27, %v498_v52  ;;  %v517_v61 = vmul.f32 %v1303_v43, %v516_v45 }
  0x61   : > { %v541_v62 = vmul.f32 %v1237_v15, %v540_v51  ;;  %v552_v63 = vstv %s1430_s7  ;;  %v545_v4 = vmul.f32 %v544_v54, %v1247_v21  ;;  %v549_v5 = vmul.f32 %v1250_v22, %v548_v55  ;;  %s1517_s7 = sld [smem:[#allocation4 + $0x81]] }
  0x62   : > { %v534_v1 = vadd.f32 %v533_v49, %v530_v58  ;;  %v556_v6 = vstv %s1435_s8  ;;  %v1481_v8 = vmax.f32 %v470_v57, 0.0  ;;  %v506_v9 = vadd.f32 %v505_v28, %v502_v60  ;;  %s1519_s8 = sld [smem:[#allocation4 + $0x82]] }
  0x63   : > { %v560_v11 = vstv %s1439_s9  ;;  %v569_v12 = vstv %s1441_s10  ;;  %v553_v14 = vmul.f32 %v1257_v24, %v552_v63  ;;  %v572_v17 = vstv %s1446_s11  ;;  %s1527_s9 = sld [smem:[#allocation4 + $0x4]]  ;;  %s1529_s10 = sld [smem:[#allocation4 + $0x83]] }
  0x64   : > { %v538_v13 = vadd.f32 %v537_v59, %v534_v1  ;;  %v570_v16 = vmul.f32 %v1217_v0, %v569_v12  ;;  %v510_v18 = vadd.f32 %v509_v36, %v506_v9  ;;  %v573_v19 = vmul.f32 %v1220_v2, %v572_v17  ;;  %s1535_s11 = sld [smem:[#allocation4 + $0x84]] }
  0x65   : > { %v576_v20 = vstv %s1451_s12  ;;  %v580_v23 = vstv %s1453_s13  ;;  %v564_v27 = vstv %s1457_s14  ;;  %v584_v0 = vstv %s1459_s20  ;;  %s1537_s12 = sld [smem:[#allocation4 + $0x100]]  ;;  %s1542_s13 = sld [smem:[#allocation4 + $0x101]] }
  0x66   : > { %v542_v26 = vadd.f32 %v541_v62, %v538_v13  ;;  %v577_v28 = vmul.f32 %v1223_v3, %v576_v20  ;;  %v514_v30 = vadd.f32 %v513_v53, %v510_v18  ;;  %v574_v31 = vadd.f32 %v573_v19, %v570_v16  ;;  %s1544_s14 = sld [smem:[#allocation4 + $0x102]]  ;;  %s1552_s20 = sld [smem:[#allocation4 + $0x103]] }
  0x67   : > { %v581_v32 = vmul.f32 %v1227_v7, %v580_v23  ;;  %v588_v33 = vstv %s1464_s21  ;;  %v557_v34 = vmul.f32 %v1262_v25, %v556_v6  ;;  %v592_v35 = vstv %s1469_s22  ;;  %s1556_s21 = sld [smem:[#allocation4 + $0x104]]  ;;  %s1565_s22 = sld [smem:[#allocation4 + $0x5]] }
  0x68   : > { %v546_v2 = vadd.f32 %v545_v4, %v542_v26  ;;  %v596_v36 = vstv %s1471_s23  ;;  %v518_v3 = vadd.f32 %v517_v61, %v514_v30  ;;  %v561_v37 = vmul.f32 %v1277_v29, %v560_v11  ;;  %s1570_s23 = sld [smem:[#allocation4 + $0x85]] }
  0x69   : > { %v578_v39 = vadd.f32 %v577_v28, %v574_v31  ;;  %v585_v7 = vmul.f32 %v1232_v10, %v584_v0  ;;  %v565_v42 = vmul.f32 %v1303_v43, %v564_v27  ;;  %v589_v44 = vmul.f32 %v1237_v15, %v588_v33 }
  0x6a   : > { %v550_v41 = vadd.f32 %v549_v5, %v546_v2  ;;  %v600_v40 = vstv %s1479_s25  ;;  %v593_v46 = vmul.f32 %v592_v35, %v1247_v21  ;;  %v597_v47 = vmul.f32 %v1250_v22, %v596_v36  ;;  %s1572_s25 = sld [smem:[#allocation4 + $0x105]] }
  0x6b   : > { %v582_v45 = vadd.f32 %v581_v32, %v578_v39  ;;  %v604_v48 = vstv %s1485_s26  ;;  %v1531_v10 = vmax.f32 %v518_v3, 0.0  ;;  %v608_v49 = vstv %s1490_s27 }
  0x6c   : > { %v554_v50 = vadd.f32 %v553_v14, %v550_v41  ;;  %v617_v51 = vstv %s1492_s24  ;;  %v601_v21 = vmul.f32 %v1257_v24, %v600_v40  ;;  %v620_v52 = vstv %s1497_s28 }
  0x6d   : > { %v586_v15 = vadd.f32 %v585_v7, %v582_v45  ;;  %v618_v22 = vmul.f32 %v617_v51, %v1376_v38  ;;  %v605_v54 = vmul.f32 %v1262_v25, %v604_v48  ;;  %v621_v55 = vmul.f32 %v620_v52, %v1466_v56  ;;  %v903_v52 = vld [vmem:[%s1214_s18 + $0x1] ss:$8 sm:$0x3] }
  0x6e   : > { %v558_v53 = vadd.f32 %v557_v34, %v554_v50  ;;  %v624_v57 = vstv %s1502_s29  ;;  %v609_v59 = vmul.f32 %v1277_v29, %v608_v49  ;;  %v628_v60 = vstv %s1506_s30  ;;  %v323_v49 = vld [vmem:[%s1214_s18] ss:$8 sm:$0x3] }
  0x6f   : > { %v590_v58 = vadd.f32 %v589_v44, %v586_v15  ;;  %v625_v24 = vmul.f32 %v624_v57, %v1481_v8  ;;  %v612_v62 = vstv %s1511_s5  ;;  %v622_v63 = vadd.f32 %v621_v55, %v618_v22 }
  0x70   : > { %v562_v61 = vadd.f32 %v561_v37, %v558_v53  ;;  %v647_v1 = vstv %s1513_s6  ;;  %v650_v5 = vstv %s1517_s7  ;;  %v654_v6 = vstv %s1519_s8  ;;  %v904_v53 = vld [vmem:[%s1214_s18 + $0x2] ss:$8 sm:$0x3]  ;;  %s1000_s18 = sshll.u32 %s1621_s15, 3 }
  0x71   : > { %v594_v25 = vadd.f32 %v593_v46, %v590_v58  ;;  %v648_v4 = vmul.f32 %v647_v1, %v1376_v38  ;;  %v629_v9 = vmul.f32 %v628_v60, %v1531_v10  ;;  %v651_v11 = vmul.f32 %v650_v5, %v1466_v56  ;;  %s298_s24 = scalar_lea.vmem %s1607_s4, %s1000_s18 }
  0x72   : > { %v566_v29 = vadd.f32 %v565_v42, %v562_v61  ;;  %v655_v12 = vmul.f32 %v654_v6, %v1481_v8  ;;  %v626_v14 = vadd.f32 %v625_v24, %v622_v63  ;;  %v632_v16 = vstv %s1527_s9 }
  0x73   : > { %v598_v13 = vadd.f32 %v597_v47, %v594_v25  ;;  %v658_v17 = vstv %s1529_s10  ;;  %v652_v19 = vadd.f32 %v651_v11, %v648_v4  ;;  %v662_v23 = vstv %s1535_s11 }
  0x74   : > { %v567_v18 = vmax.f32 %v566_v29, 0.0  ;;  %v659_v20 = vmul.f32 %v658_v17, %v1531_v10  ;;  %v677_v27 = vstv %s1537_s12  ;;  %v680_v28 = vstv %s1542_s13 }
  0x75   : > { %v602_v26 = vadd.f32 %v601_v21, %v598_v13  ;;  %v684_v0 = vstv %s1544_s14  ;;  %v613_v30 = vmul.f32 %v1303_v43, %v612_v62  ;;  %v656_v31 = vadd.f32 %v655_v12, %v652_v19 }
  0x76   : > { %v678_v32 = vmul.f32 %v677_v27, %v1376_v38  ;;  %v681_v2 = vmul.f32 %v680_v28, %v1466_v56  ;;  %v685_v34 = vmul.f32 %v684_v0, %v1481_v8  ;;  %v688_v35 = vstv %s1552_s20 }
  0x77   : > { %v606_v33 = vadd.f32 %v605_v54, %v602_v26  ;;  %v630_v36 = vadd.f32 %v629_v9, %v626_v14  ;;  %v633_v3 = vmul.f32 %v632_v16, %v567_v18  ;;  %v663_v37 = vmul.f32 %v662_v23, %v567_v18 }
  0x78   : > { %v692_v39 = vstv %s1556_s21  ;;  %v660_v41 = vadd.f32 %v659_v20, %v656_v31  ;;  %v682_v43 = vadd.f32 %v681_v2, %v678_v32  ;;  %v689_v42 = vmul.f32 %v688_v35, %v1531_v10 }
  0x79   : > { %v610_v7 = vadd.f32 %v609_v59, %v606_v33  ;;  %v693_v40 = vmul.f32 %v692_v39, %v567_v18  ;;  %v636_v56 = vstv %s1565_s22  ;;  %v666_v45 = vstv %s1570_s23 }
  0x7a   : > { %v686_v44 = vadd.f32 %v685_v34, %v682_v43  ;;  %v696_v46 = vstv %s1572_s25  ;;  %v634_v47 = vadd.f32 %v633_v3, %v630_v36  ;;  %v664_v48 = vadd.f32 %v663_v37, %v660_v41 }
  0x7b   : > { %v614_v38 = vadd.f32 %v613_v30, %v610_v7  ;;  %v707_v5 = vlaneseq }
  0x7c   : > { %v690_v50 = vadd.f32 %v689_v42, %v686_v44 }
  0x7d   : > { %v615_v8 = vmax.f32 %v614_v38, 0.0  ;;  %v708_v29 = vshrl.u32 %v707_v5, 7 }
  0x7e   : > { %v694_v21 = vadd.f32 %v693_v40, %v690_v50 }
  0x7f   : > { %v637_v51 = vmul.f32 %v636_v56, %v615_v8  ;;  %v667_v15 = vmul.f32 %v666_v45, %v615_v8  ;;  %v697_v22 = vmul.f32 %v696_v46, %v615_v8  ;;  %v709_v9 = vsub.s32 0, %v708_v29 }
  0x80   : > { %v713_v11 = vsub.s32 1, %v708_v29 }
  0x81   : > { %v638_v10 = vadd.f32 %v637_v51, %v634_v47  ;;  %v668_v54 = vadd.f32 %v667_v15, %v664_v48  ;;  %v698_v55 = vadd.f32 %v697_v22, %v694_v21 }
  0x83   : > { %v639_v57 = vadd.f32 %v638_v10, %v323_v49  ;;  %v669_v58 = vadd.f32 %v903_v52, %v668_v54  ;;  %v699_v59 = vadd.f32 %v904_v53, %v698_v55 }
  0x85   : > { %v981_v24 = vmul.f32 -1.442695, %v639_v57  ;;  %v988_v60 = vmul.f32 -1.442695, %v669_v58  ;;  %v995_v61 = vmul.f32 -1.442695, %v699_v59 }
  0x87   : > { %1046 = vpow2.f32 %v981_v24 }
  0x88   : > { %1048 = vpow2.f32 %v988_v60 }
  0x89   : > { %1050 = vpow2.f32 %v995_v61 }
  0x91   : > { %v1047_v62 = vpop.eup %1046 }
  0x92   : > { %v1049_v63 = vpop.eup %1048  ;;  %v643_v1 = vadd.f32 1.0, %v1047_v62 }
  0x93   : > { %v1051_v25 = vpop.eup %1050  ;;  %v673_v4 = vadd.f32 1.0, %v1049_v63 }
  0x94   : > { %1052 = vrcp.f32 %v643_v1  ;;  %v703_v6 = vadd.f32 1.0, %v1051_v25 }
  0x95   : > { %1054 = vrcp.f32 %v673_v4 }
  0x96   : > { %1056 = vrcp.f32 %v703_v6 }
  0x9e   : > { %v1053_v12 = vpop.eup %1052 }
  0x9f   : > { %v1055_v13 = vpop.eup %1054  ;;  %v710_v14 = vrot.slane %v1053_v12, %v709_v9  ;;  %v714_v16 = vrot.slane %v1053_v12, %v713_v11 }
  0xa0   : > { %v1057_v17 = vpop.eup %1056  ;;  %v721_v18 = vrot.slane %v1055_v13, %v709_v9  ;;  %v725_v19 = vrot.slane %v1055_v13, %v713_v11 }
  0xa1   : > { %v732_v20 = vrot.slane %v1057_v17, %v709_v9  ;;  %v736_v23 = vrot.slane %v1057_v17, %v713_v11 }
  0xa2   : > { %v740_v26 = vsel %vm739_vm0, %v710_v14, %v721_v18  ;;  %v741_v27 = vsel %vm739_vm0, %v714_v16, %v725_v19 }
  0xa3   : > { %v743_v28 = vsel %vm742_vm1, %v740_v26, %v732_v20  ;;  %v744_v0 = vsel %vm742_vm1, %v741_v27, %v736_v23 }
  0xa4   : > { %v747_v30 = vcombine.low %v743_v28, %v744_v0 }
  0xa6   : > { %749 = vst [vmem:[%s298_s24] sm:$0x77] %v747_v30 }
  0xa7 PF: > { %s16_s17 = sadd.s32 1, %s1118_s17   ;;  %s1616_s15 = smov %s1114_s16 }
  0xa8   : > { %p13_p4 = scmp.ge.s32.totalorder %s16_s17, 4   ;;  %s1617_s16 = smov %s1619_s19 }
  0xaa   :  { %15 = sbr.rel (!%p13_p4) target bundleno = 3 (0x3), region = 91 }
  0xb1   :  { %780 = vsyncpa [#allocation3], 1 }
  0xb2   :  { %782 = vsyncpa [#allocation3 + $0x1], 1 }
  0xb3   :  { %783 = vsyncpa [#allocation5], 1 }

</bundles_post_ra>
